<compile_context>
chip_gen: v7x
topology: tpu7x:2x2x1
jax: 0.10.0
libtpu: 0.0.40
codegen_flags: <defaults>
</compile_context>

<pallas_src>
import functools

import jax
import jax.numpy as jnp
from jax import lax
from jax.experimental import pallas as pl
from jax.experimental.pallas import tpu as pltpu


def _round_up(x, m):
    return ((x + m - 1) // m) * m


def _linear_kernel_single(x_ref, w_ref, b_ref, o_ref):
    """Single-K-tile path: one fused x @ W.T + b per (tm, tn) output tile."""
    acc = lax.dot_general(
        x_ref[...], w_ref[...],
        dimension_numbers=(((1,), (1,)), ((), ())),
        preferred_element_type=jnp.float32)
    o_ref[...] = (acc + b_ref[...]).astype(o_ref.dtype)


def _linear_kernel_acc(x_ref, w_ref, b_ref, o_ref, acc_ref):
    """Multi-K-tile path: accumulate over the K grid axis in f32 VMEM scratch."""
    k = pl.program_id(2)

    @pl.when(k == 0)
    def _():
        acc_ref[...] = jnp.zeros_like(acc_ref)

    # x_ref: (tm, tk), w_ref: (tn, tk)  ->  x @ W.T tile on the MXU, f32 acc.
    acc_ref[...] += lax.dot_general(
        x_ref[...], w_ref[...],
        dimension_numbers=(((1,), (1,)), ((), ())),
        preferred_element_type=jnp.float32)

    @pl.when(k == pl.num_programs(2) - 1)
    def _():
        o_ref[...] = (acc_ref[...] + b_ref[...]).astype(o_ref.dtype)


def _pad2(a, shape):
    if a.shape == tuple(shape):
        return a
    return jnp.pad(a, [(0, shape[0] - a.shape[0]), (0, shape[1] - a.shape[1])])


@functools.partial(jax.jit, static_argnames=("compute_dtype", "tm_max", "tn_max", "tk_max"))
def linear_classifier_forward(features, weight, bias, *, compute_dtype=None,
                              tm_max=128, tn_max=256, tk_max=1024):
    """features: (B, ...) any trailing shape; weight: (num_classes, input_dim);
    bias: (num_classes,). Returns (B, num_classes)."""
    if isinstance(features, tuple):
        features = features[0]
    B = features.shape[0]
    x = features.reshape(B, -1)            # == features.view(B, -1)
    D = x.shape[1]
    C, D_w = weight.shape
    assert D_w == D, (weight.shape, D)

    out_dtype = x.dtype
    if compute_dtype is None:
        compute_dtype = x.dtype

    # Tile sizes: lane dims (tk, tn) multiples of 128, sublane dim (tm) of 8.
    tm = min(tm_max, _round_up(B, 8))
    tk = min(tk_max, _round_up(D, 128))
    tn = min(tn_max, _round_up(C, 128))

    Bp = _round_up(B, tm)
    Dp = _round_up(D, tk)
    Cp = _round_up(C, tn)

    # Zero-pad (no-ops when already aligned). Padding the contraction dim with
    # zeros keeps the matmul exact; padded output rows/cols are sliced away.
    x_p = _pad2(x.astype(compute_dtype), (Bp, Dp))
    w_p = _pad2(weight.astype(compute_dtype), (Cp, Dp))   # stays (C, D): no transpose
    b_p = _pad2(bias.astype(jnp.float32).reshape(1, C), (1, Cp))

    grid_m, grid_n, grid_k = Bp // tm, Cp // tn, Dp // tk

    itemsize = jnp.dtype(compute_dtype).itemsize
    cost = pl.CostEstimate(
        flops=2 * Bp * Dp * Cp,
        transcendentals=0,
        bytes_accessed=(Bp * Dp + Cp * Dp) * itemsize
                       + Cp * 4
                       + Bp * Cp * jnp.dtype(out_dtype).itemsize,
    )

    if grid_k == 1:
        # Whole reduction fits in one K tile: fused single-shot kernel,
        # no scratch accumulator, no branch overhead.
        out_p = pl.pallas_call(
            _linear_kernel_single,
            out_shape=jax.ShapeDtypeStruct((Bp, Cp), out_dtype),
            grid_spec=pltpu.PrefetchScalarGridSpec(
                num_scalar_prefetch=0,
                grid=(grid_m, grid_n),
                in_specs=[
                    pl.BlockSpec((tm, Dp), lambda i, j: (i, 0)),   # x tile
                    pl.BlockSpec((tn, Dp), lambda i, j: (j, 0)),   # W tile (C,D) layout
                    pl.BlockSpec((1, tn), lambda i, j: (0, j)),    # bias strip
                ],
                out_specs=pl.BlockSpec((tm, tn), lambda i, j: (i, j)),
            ),
            compiler_params=pltpu.CompilerParams(
                dimension_semantics=("parallel", "parallel"),
                vmem_limit_bytes=64 * 1024 * 1024,
            ),
            cost_estimate=cost,
        )(x_p, w_p, b_p)
    else:
        out_p = pl.pallas_call(
            _linear_kernel_acc,
            out_shape=jax.ShapeDtypeStruct((Bp, Cp), out_dtype),
            grid_spec=pltpu.PrefetchScalarGridSpec(
                num_scalar_prefetch=0,
                grid=(grid_m, grid_n, grid_k),
                in_specs=[
                    pl.BlockSpec((tm, tk), lambda i, j, k: (i, k)),   # x tile
                    pl.BlockSpec((tn, tk), lambda i, j, k: (j, k)),   # W tile (C,D)
                    pl.BlockSpec((1, tn), lambda i, j, k: (0, j)),    # bias strip
                ],
                out_specs=pl.BlockSpec((tm, tn), lambda i, j, k: (i, j)),
                scratch_shapes=[pltpu.VMEM((tm, tn), jnp.float32)],
            ),
            compiler_params=pltpu.CompilerParams(
                dimension_semantics=("parallel", "parallel", "arbitrary"),
                vmem_limit_bytes=64 * 1024 * 1024,
            ),
            cost_estimate=cost,
        )(x_p, w_p, b_p)

    return out_p[:B, :C]


if __name__ == "__main__":
    key = jax.random.PRNGKey(0)
    k_x, k_w, k_b = jax.random.split(key, 3)

    # Small shapes consistent with the module: encoder features (B, 4, 16, 16)
    # are flattened to input_dim = 4*16*16 = 1024, classified into 8 classes.
    B, Cch, H, W = 2, 4, 16, 16
    input_dim = Cch * H * W
    num_classes = 8

    features = jax.random.normal(k_x, (B, Cch, H, W), dtype=jnp.float32)

    # nn.Linear(input_dim, num_classes): weight (C, D), bias (C,)
    bound = 1.0 / (input_dim ** 0.5)
    weight = jax.random.uniform(k_w, (num_classes, input_dim),
                                minval=-bound, maxval=bound, dtype=jnp.float32)
    bias = jax.random.uniform(k_b, (num_classes,),
                              minval=-bound, maxval=bound, dtype=jnp.float32)

    ref = features.reshape(B, -1) @ weight.T + bias

    # Full-precision path (exact check) — single-shot kernel (D=1024 -> 1 K tile).
    out_f32 = jax.block_until_ready(linear_classifier_forward(features, weight, bias))
    assert out_f32.shape == (B, num_classes)
    assert jnp.allclose(out_f32, ref, atol=1e-5, rtol=1e-5), \
        float(jnp.max(jnp.abs(out_f32 - ref)))

    # Multi-K accumulate path (force small tk) — exercises the pl.when kernel.
    out_acc = jax.block_until_ready(
        linear_classifier_forward(features, weight, bias, tk_max=256))
    assert out_acc.shape == (B, num_classes)
    assert jnp.allclose(out_acc, ref, atol=1e-5, rtol=1e-5), \
        float(jnp.max(jnp.abs(out_acc - ref)))

    # bf16-operand MXU path (halved HBM traffic; f32 accumulation), looser tol.
    out_bf16 = jax.block_until_ready(
        linear_classifier_forward(features, weight, bias, compute_dtype=jnp.bfloat16))
    assert out_bf16.shape == (B, num_classes)
    assert jnp.allclose(out_bf16, ref, atol=2e-2, rtol=2e-2), \
        float(jnp.max(jnp.abs(out_bf16 - ref)))

    print("KERNEL_OK")
</pallas_src>

<mosaic_0001>
module attributes {stable_mosaic.version = 11 : i64} {
  func.func @_linear_kernel_single(%arg0: i32, %arg1: i32, %arg2: memref<8x1024xf32, #tpu.memory_space<vmem>>, %arg3: memref<128x1024xf32, #tpu.memory_space<vmem>>, %arg4: memref<1x128xf32, #tpu.memory_space<vmem>>, %arg5: memref<8x128xf32, #tpu.memory_space<vmem>>) attributes {dimension_semantics = [#tpu.dimension_semantics<parallel>, #tpu.dimension_semantics<parallel>], iteration_bounds = array<i64: 1, 1>, scalar_prefetch = 0 : i64, scratch_operands = 0 : i64, tpu.core_type = #tpu.core_type<tc>, window_params = [{transform_indices = @transform_0, window_bounds = array<i64: 8, 1024>}, {transform_indices = @transform_1, window_bounds = array<i64: 128, 1024>}, {transform_indices = @transform_2, window_bounds = array<i64: 1, 128>}, {transform_indices = @transform_3, window_bounds = array<i64: 8, 128>}]} {
    %c0 = arith.constant 0 : index
    %c0_0 = arith.constant 0 : index
    %0 = vector.load %arg2[%c0, %c0_0] : memref<8x1024xf32, #tpu.memory_space<vmem>>, vector<8x1024xf32>
    %c0_1 = arith.constant 0 : index
    %c0_2 = arith.constant 0 : index
    %1 = vector.load %arg3[%c0_1, %c0_2] : memref<128x1024xf32, #tpu.memory_space<vmem>>, vector<128x1024xf32>
    %cst = arith.constant dense<0.000000e+00> : vector<8x128xf32>
    %2 = tpu.matmul %0, %1, %cst {dimension_numbers = #tpu.dot_dimension_numbers<[1], [1], [0], [0], [0, 0, 1, 0], [], []>} : vector<8x1024xf32>, vector<128x1024xf32>, vector<8x128xf32> -> vector<8x128xf32>
    %c0_3 = arith.constant 0 : index
    %c0_4 = arith.constant 0 : index
    %3 = vector.load %arg4[%c0_3, %c0_4] : memref<1x128xf32, #tpu.memory_space<vmem>>, vector<1x128xf32>
    %4 = vector.broadcast %3 : vector<1x128xf32> to vector<8x128xf32>
    %5 = arith.addf %2, %4 : vector<8x128xf32>
    %c0_5 = arith.constant 0 : index
    %c0_6 = arith.constant 0 : index
    %6 = vector.load %arg5[%c0_5, %c0_6] : memref<8x128xf32, #tpu.memory_space<vmem>>, vector<8x128xf32>
    tpu.vector_store %arg5[%c0_5, %c0_6], %5 {strides = array<i32>} : memref<8x128xf32, #tpu.memory_space<vmem>>, vector<8x128xf32>,
    return
  }
  func.func @transform_0(%arg0: i32, %arg1: i32) -> (i32, i32) {
    %c0_i32 = arith.constant 0 : i32
    %c0_i32_0 = arith.constant 0 : i32
    return %arg0, %c0_i32 : i32, i32
  }
  func.func @transform_1(%arg0: i32, %arg1: i32) -> (i32, i32) {
    %c0_i32 = arith.constant 0 : i32
    %c0_i32_0 = arith.constant 0 : i32
    return %arg1, %c0_i32 : i32, i32
  }
  func.func @transform_2(%arg0: i32, %arg1: i32) -> (i32, i32) {
    %c0_i32 = arith.constant 0 : i32
    %c0_i32_0 = arith.constant 0 : i32
    return %c0_i32, %arg1 : i32, i32
  }
  func.func @transform_3(%arg0: i32, %arg1: i32) -> (i32, i32) {
    %c0_i32 = arith.constant 0 : i32
    return %arg0, %arg1 : i32, i32
  }
}

</mosaic_0001>

<bundles_post_ra>
// kernel: linear_classifier_forward.1
= control target key start
LH: loop header
LB: loop body
LE: loop exit
PB: predicated region body
PF: predicated region fallthrough
CT: control target
= control target key end

     0   :  { %8 = vsyncpa [#allocation3], 0  ;;  %s801_s0 = inlined_call_operand.hbm [shape: f32[8,1024], index: 0, kind: input, shape index: {}]   ;;  %s802_s1 = inlined_call_operand.hbm [shape: f32[128,1024], index: 1, kind: input, shape index: {}]   ;;  %s803_s2 = inlined_call_operand.hbm [shape: f32[1,128], index: 2, kind: input, shape index: {}]   ;;  %s804_s3 = inlined_call_operand.hbm [shape: f32[8,128], index: 3, kind: output, shape index: {}]  }
   0x1   :  { %9 = vsyncpa [#allocation6], 0 }
   0x2   :  { %10 = vsyncpa [#allocation4], 0  ;;  %s727_s12 = smov [#allocation5]   ;;  %s633_s16 = scalar_lea.hbm %s802_s1, 16384 }
   0x3   :  { %s26_s13 = sshll.u32 %s727_s12, 4  ;;  %p634_p0 = scmp.ne.s32.totalorder %s802_s1, %s633_s16  ;;  %s27_s13 = int_to_ptr.vmem [resolvable:$true] %s26_s13 }
   0x4   :  { %p637_p1 = scmp.lt.u32.totalorder %s633_s16, %s802_s1 }
   0x6   :  { %p639_p2 = pnand %p637_p1, %p634_p0 }
   0x8   :  { %642 = shalt.err (!%p639_p2)
}
   0x9   :  { %s643_s21 = scalar_lea.vmem %s27_s13, 16384  ;;  %p648_p4 = scmp.lt.s32.totalorder %s27_s13, %s27_s13 }
   0xa   :  { %p644_p3 = scmp.ne.s32.totalorder %s27_s13, %s643_s21  ;;  %p649_p5 = scmp.lt.s32.totalorder %s643_s21, %s643_s21 }
   0xc   :  { %p650_p6 = por %p649_p5, %p648_p4 }
   0xe   :  { %p651_p7 = pnand %p650_p6, %p644_p3 }
  0x10   :  { %654 = shalt.err (!%p651_p7)
}
  0x11   :  { %s728_s22 = smov 1024   ;;  %s729_s23 = smov 64  }
  0x12   :  { %32 = dma.hbm_to_vmem [thread:$0]  %s802_s1, 16384, %s27_s13, [#allocation6], %s728_s22, %s728_s22, %s729_s23  }
  0x13   :  { %s730_s26 = smov [#allocation2]   ;;  %s731_s28 = smov [#allocation7]  }
  0x14   :  { %s17_s27 = sshll.u32 %s730_s26, 4  ;;  %s39_s29 = sshll.u32 %s731_s28, 4  ;;  %s18_s27 = int_to_ptr.vmem [resolvable:$true] %s17_s27  ;;  %s40_s29 = int_to_ptr.vmem [resolvable:$true] %s39_s29 }
  0x15   :  { %s655_s5 = scalar_lea.hbm %s801_s0, 1024 }
  0x16   :  { %p656_p8 = scmp.ne.s32.totalorder %s801_s0, %s655_s5  ;;  %p659_p9 = scmp.lt.u32.totalorder %s655_s5, %s801_s0 }
  0x18   :  { %p661_p10 = pnand %p659_p9, %p656_p8 }
  0x1a   :  { %664 = shalt.err (!%p661_p10)
}
  0x1b   :  { %s665_s1 = scalar_lea.vmem %s18_s27, 1024  ;;  %p670_p12 = scmp.lt.s32.totalorder %s18_s27, %s18_s27 }
  0x1c   :  { %p666_p11 = scmp.ne.s32.totalorder %s18_s27, %s665_s1  ;;  %p671_p13 = scmp.lt.s32.totalorder %s665_s1, %s665_s1 }
  0x1e   :  { %p672_p0 = por %p671_p13, %p670_p12 }
  0x20   :  { %p673_p1 = pnand %p672_p0, %p666_p11 }
  0x22   :  { %676 = shalt.err (!%p673_p1)
}
  0x23   :  { %20 = dma.hbm_to_vmem [thread:$0]  %s801_s0, 1024, %s18_s27, [#allocation3]  }
  0x24   :  { %s677_s14 = scalar_lea.hbm %s803_s2, 16 }
  0x25   :  { %p678_p2 = scmp.ne.s32.totalorder %s803_s2, %s677_s14  ;;  %p681_p3 = scmp.lt.u32.totalorder %s677_s14, %s803_s2 }
  0x27   :  { %p683_p4 = pnand %p681_p3, %p678_p2 }
  0x29   :  { %686 = shalt.err (!%p683_p4)
}
  0x2a   :  { %s687_s19 = scalar_lea.vmem %s40_s29, 16  ;;  %s691_s20 = scalar_lea.vmem %s40_s29, 32 }
  0x2b   :  { %p688_p5 = scmp.ne.s32.totalorder %s40_s29, %s687_s19  ;;  %p692_p6 = scmp.lt.s32.totalorder %s40_s29, %s40_s29 }
  0x2c   :  { %p693_p7 = scmp.lt.s32.totalorder %s691_s20, %s687_s19 }
  0x2e   :  { %p694_p8 = por %p693_p7, %p692_p6 }
  0x30   :  { %p695_p9 = pnand %p694_p8, %p688_p5 }
  0x32   :  { %698 = shalt.err (!%p695_p9)
}
  0x33   :  { %42 = dma.hbm_to_vmem [thread:$0]  %s803_s2, 16, %s40_s29, [#allocation6]  }
  0x34   :  { %721 = dma.done.wait [#allocation3], 1024  }
  0x35   :  { %722 = vsyncadd [#allocation3], 4294966272 }
  0x36   :  { %723 = dma.done.wait [#allocation6], 16400  }
  0x37   :  { %724 = vsyncadd [#allocation6], 4294950896  ;;  %v61_v0 = vld [vmem:[#allocation5 + $0x8] sm:$0xff]  ;;  %v60_v5 = vld [vmem:[#allocation5] sm:$0xff]  ;;  %s732_s2 = smov [#allocation8]  }
  0x38   :  { %v69_v1 = vld [vmem:[#allocation5 + $0x48] sm:$0xff]  ;;  %v68_v6 = vld [vmem:[#allocation5 + $0x40] sm:$0xff]  ;;  %s482_s22 = sshll.u32 %s732_s2, 4  ;;  %s483_s22 = int_to_ptr.vmem [resolvable:$true] %s482_s22 }
  0x39   :  { %v65_v2 = vld [vmem:[#allocation5 + $0x28] sm:$0xff]  ;;  %v493_v3 = vpack.c.bf16 %v69_v1, %v61_v0  ;;  %v495_v8 = vpack.c.bf16 %v68_v6, %v60_v5  ;;  %v64_v9 = vld [vmem:[#allocation5 + $0x20] sm:$0xff]  ;;  %s699_s23 = scalar_lea.vmem %s483_s22, 128  ;;  %p704_p11 = scmp.lt.s32.totalorder %s483_s22, %s483_s22 }
  0x3a   :  { %v73_v4 = vld [vmem:[#allocation5 + $0x68] sm:$0xff]  ;;  %v72_v10 = vld [vmem:[#allocation5 + $0x60] sm:$0xff]  ;;  %p700_p10 = scmp.ne.s32.totalorder %s483_s22, %s699_s23  ;;  %p705_p12 = scmp.lt.s32.totalorder %s699_s23, %s699_s23 }
  0x3b   :  { %v557_v7 = vpack.c.bf16 %v73_v4, %v65_v2  ;;  %v77_v11 = vld [vmem:[#allocation5 + $0x88] sm:$0xff]  ;;  %494 = vmatprep.subr.bf16.mxu1 %v493_v3  ;;  %v559_v12 = vpack.c.bf16 %v72_v10, %v64_v9  ;;  %v76_v18 = vld [vmem:[#allocation5 + $0x80] sm:$0xff] }
  0x3c   :  { %v85_v13 = vld [vmem:[#allocation5 + $0xc8] sm:$0xff]  ;;  %496 = vmatpush1.bf16.xpose.msra.mxu1 %v495_v8  ;;  %v84_v19 = vld [vmem:[#allocation5 + $0xc0] sm:$0xff]  ;;  %p706_p13 = por %p705_p12, %p704_p11 }
  0x3d   :  { %v81_v14 = vld [vmem:[#allocation5 + $0xa8] sm:$0xff]  ;;  %558 = vmatprep.subr.bf16.mxu0 %v557_v7  ;;  %v497_v16 = vpack.c.bf16 %v85_v13, %v77_v11  ;;  %v80_v20 = vld [vmem:[#allocation5 + $0xa0] sm:$0xff]  ;;  %v499_v26 = vpack.c.bf16 %v84_v19, %v76_v18 }
  0x3e   :  { %v89_v15 = vld [vmem:[#allocation5 + $0xe8] sm:$0xff]  ;;  %560 = vmatpush1.bf16.xpose.msra.mxu0 %v559_v12  ;;  %v88_v21 = vld [vmem:[#allocation5 + $0xe0] sm:$0xff]  ;;  %p707_p0 = pnand %p706_p13, %p700_p10 }
  0x3f   :  { %v561_v17 = vpack.c.bf16 %v89_v15, %v81_v14  ;;  %498 = vmatprep.subr.bf16.mxu1 %v497_v16  ;;  %v93_v22 = vld [vmem:[#allocation5 + $0x108] sm:$0xff]  ;;  %v563_v27 = vpack.c.bf16 %v88_v21, %v80_v20  ;;  %v92_v30 = vld [vmem:[#allocation5 + $0x100] sm:$0xff] }
  0x40   :  { %v101_v23 = vld [vmem:[#allocation5 + $0x148] sm:$0xff]  ;;  %v100_v31 = vld [vmem:[#allocation5 + $0x140] sm:$0xff] }
  0x41   :  { %562 = vmatprep.subr.bf16.mxu0 %v561_v17  ;;  %v97_v24 = vld [vmem:[#allocation5 + $0x128] sm:$0xff]  ;;  %v501_v28 = vpack.c.bf16 %v101_v23, %v93_v22  ;;  %v96_v32 = vld [vmem:[#allocation5 + $0x120] sm:$0xff]  ;;  %v503_v38 = vpack.c.bf16 %v100_v31, %v92_v30 }
  0x42   :  { %v105_v25 = vld [vmem:[#allocation5 + $0x168] sm:$0xff]  ;;  %v104_v33 = vld [vmem:[#allocation5 + $0x160] sm:$0xff] }
  0x43   :  { %v565_v29 = vpack.c.bf16 %v105_v25, %v97_v24  ;;  %v109_v34 = vld [vmem:[#allocation5 + $0x188] sm:$0xff]  ;;  %v567_v39 = vpack.c.bf16 %v104_v33, %v96_v32  ;;  %v108_v42 = vld [vmem:[#allocation5 + $0x180] sm:$0xff]  ;;  %v63_v32 = vld [vmem:[#allocation5 + $0x18] sm:$0xff] }
  0x44   :  { %500 = vmatpush1.bf16.xpose.msra.mxu1 %v499_v26  ;;  %v117_v35 = vld [vmem:[#allocation5 + $0x1c8] sm:$0xff]  ;;  %v116_v43 = vld [vmem:[#allocation5 + $0x1c0] sm:$0xff]  ;;  %v71_v33 = vld [vmem:[#allocation5 + $0x58] sm:$0xff] }
  0x45   :  { %502 = vmatprep.subr.bf16.mxu1 %v501_v28  ;;  %v113_v36 = vld [vmem:[#allocation5 + $0x1a8] sm:$0xff]  ;;  %v505_v40 = vpack.c.bf16 %v117_v35, %v109_v34  ;;  %v112_v44 = vld [vmem:[#allocation5 + $0x1a0] sm:$0xff]  ;;  %v507_v52 = vpack.c.bf16 %v116_v43, %v108_v42  ;;  %v67_v34 = vld [vmem:[#allocation5 + $0x38] sm:$0xff] }
  0x46   :  { %564 = vmatpush1.bf16.xpose.msra.mxu0 %v563_v27  ;;  %v121_v37 = vld [vmem:[#allocation5 + $0x1e8] sm:$0xff]  ;;  %v120_v45 = vld [vmem:[#allocation5 + $0x1e0] sm:$0xff]  ;;  %v75_v35 = vld [vmem:[#allocation5 + $0x78] sm:$0xff] }
  0x47   :  { %566 = vmatprep.subr.bf16.mxu0 %v565_v29  ;;  %v569_v41 = vpack.c.bf16 %v121_v37, %v113_v36  ;;  %v53_v46 = vld [vmem:[#allocation2 + $0x8] sm:$0xff]  ;;  %v571_v53 = vpack.c.bf16 %v120_v45, %v112_v44  ;;  %v124_v56 = vld [vmem:[#allocation5 + $0x200] sm:$0xff]  ;;  %v66_v42 = vld [vmem:[#allocation5 + $0x30] sm:$0xff] }
  0x48   :  { %v125_v47 = vld [vmem:[#allocation5 + $0x208] sm:$0xff]  ;;  %259 = vmatprep.mubr.f32.mxu1 %v53_v46  ;;  %v132_v57 = vld [vmem:[#allocation5 + $0x240] sm:$0xff]  ;;  %v74_v43 = vld [vmem:[#allocation5 + $0x70] sm:$0xff] }
  0x49   :  { %v133_v48 = vld [vmem:[#allocation5 + $0x248] sm:$0xff]  ;;  %v128_v58 = vld [vmem:[#allocation5 + $0x220] sm:$0xff]  ;;  %v511_v0 = vpack.c.bf16 %v132_v57, %v124_v56  ;;  %v79_v44 = vld [vmem:[#allocation5 + $0x98] sm:$0xff] }
  0x4a   :  { %v57_v49 = vld [vmem:[#allocation2 + $0x28] sm:$0xff]  ;;  %v509_v54 = vpack.c.bf16 %v133_v48, %v125_v47  ;;  %v136_v59 = vld [vmem:[#allocation5 + $0x260] sm:$0xff]  ;;  %v87_v45 = vld [vmem:[#allocation5 + $0xd8] sm:$0xff] }
  0x4b   :  { %v129_v50 = vld [vmem:[#allocation5 + $0x228] sm:$0xff]  ;;  %399 = vmatprep.mubr.f32.mxu0 %v57_v49  ;;  %v575_v1 = vpack.c.bf16 %v136_v59, %v128_v58  ;;  %v140_v4 = vld [vmem:[#allocation5 + $0x280] sm:$0xff]  ;;  %v83_v46 = vld [vmem:[#allocation5 + $0xb8] sm:$0xff] }
  0x4c   :  { %504 = vmatpush1.bf16.xpose.msra.mxu1 %v503_v38  ;;  %v137_v51 = vld [vmem:[#allocation5 + $0x268] sm:$0xff]  ;;  %v148_v5 = vld [vmem:[#allocation5 + $0x2c0] sm:$0xff]  ;;  %v525_v38 = vpack.c.bf16 %v71_v33, %v63_v32  ;;  %v91_v47 = vld [vmem:[#allocation5 + $0xf8] sm:$0xff] }
  0x4d   :  { %506 = vmatprep.subr.bf16.mxu1 %v505_v40  ;;  %v573_v55 = vpack.c.bf16 %v137_v51, %v129_v50  ;;  %v141_v60 = vld [vmem:[#allocation5 + $0x288] sm:$0xff]  ;;  %v144_v6 = vld [vmem:[#allocation5 + $0x2a0] sm:$0xff]  ;;  %v515_v12 = vpack.c.bf16 %v148_v5, %v140_v4  ;;  %v62_v40 = vld [vmem:[#allocation5 + $0x10] sm:$0xff]  ;;  %v591_v51 = vpack.c.bf16 %v74_v43, %v66_v42 }
  0x4e   :  { %568 = vmatpush1.bf16.xpose.msra.mxu0 %v567_v39  ;;  %v149_v61 = vld [vmem:[#allocation5 + $0x2c8] sm:$0xff]  ;;  %v152_v7 = vld [vmem:[#allocation5 + $0x2e0] sm:$0xff]  ;;  %v589_v39 = vpack.c.bf16 %v75_v35, %v67_v34  ;;  %v78_v56 = vld [vmem:[#allocation5 + $0x90] sm:$0xff] }
  0x4f   :  { %570 = vmatprep.subr.bf16.mxu0 %v569_v41  ;;  %v145_v62 = vld [vmem:[#allocation5 + $0x2a8] sm:$0xff]  ;;  %v513_v2 = vpack.c.bf16 %v149_v61, %v141_v60  ;;  %v579_v13 = vpack.c.bf16 %v152_v7, %v144_v6  ;;  %v156_v16 = vld [vmem:[#allocation5 + $0x300] sm:$0xff]  ;;  %v70_v41 = vld [vmem:[#allocation5 + $0x50] sm:$0xff] }
  0x50   :  { %v153_v63 = vld [vmem:[#allocation5 + $0x2e8] sm:$0xff]  ;;  %v164_v17 = vld [vmem:[#allocation5 + $0x340] sm:$0xff]  ;;  %v527_v49 = vpack.c.bf16 %v70_v41, %v62_v40  ;;  %v86_v57 = vld [vmem:[#allocation5 + $0xd0] sm:$0xff] }
  0x51   :  { %v577_v3 = vpack.c.bf16 %v153_v63, %v145_v62  ;;  %v157_v8 = vld [vmem:[#allocation5 + $0x308] sm:$0xff]  ;;  %v160_v18 = vld [vmem:[#allocation5 + $0x320] sm:$0xff]  ;;  %v519_v24 = vpack.c.bf16 %v164_v17, %v156_v16  ;;  %v82_v58 = vld [vmem:[#allocation5 + $0xb0] sm:$0xff] }
  0x52   :  { %v165_v9 = vld [vmem:[#allocation5 + $0x348] sm:$0xff]  ;;  %v168_v19 = vld [vmem:[#allocation5 + $0x360] sm:$0xff]  ;;  %v90_v59 = vld [vmem:[#allocation5 + $0xf0] sm:$0xff] }
  0x53   :  { %v161_v10 = vld [vmem:[#allocation5 + $0x328] sm:$0xff]  ;;  %v517_v14 = vpack.c.bf16 %v165_v9, %v157_v8  ;;  %v583_v25 = vpack.c.bf16 %v168_v19, %v160_v18  ;;  %v172_v28 = vld [vmem:[#allocation5 + $0x380] sm:$0xff]  ;;  %v95_v60 = vld [vmem:[#allocation5 + $0x118] sm:$0xff] }
  0x54   :  { %508 = vmatpush1.bf16.xpose.msra.mxu1 %v507_v52  ;;  %v169_v11 = vld [vmem:[#allocation5 + $0x368] sm:$0xff]  ;;  %v180_v29 = vld [vmem:[#allocation5 + $0x3c0] sm:$0xff]  ;;  %v529_v52 = vpack.c.bf16 %v87_v45, %v79_v44  ;;  %v103_v61 = vld [vmem:[#allocation5 + $0x158] sm:$0xff] }
  0x55   :  { %510 = vmatprep.subr.bf16.mxu1 %v509_v54  ;;  %v581_v15 = vpack.c.bf16 %v169_v11, %v161_v10  ;;  %v173_v20 = vld [vmem:[#allocation5 + $0x388] sm:$0xff]  ;;  %v176_v30 = vld [vmem:[#allocation5 + $0x3a0] sm:$0xff]  ;;  %v523_v36 = vpack.c.bf16 %v180_v29, %v172_v28  ;;  %v55_v54 = vld [vmem:[#allocation2 + $0x18] sm:$0xff] }
  0x56   :  { %572 = vmatpush1.bf16.xpose.msra.mxu0 %v571_v53  ;;  %v181_v21 = vld [vmem:[#allocation5 + $0x3c8] sm:$0xff]  ;;  %v184_v31 = vld [vmem:[#allocation5 + $0x3e0] sm:$0xff]  ;;  %v593_v53 = vpack.c.bf16 %v91_v47, %v83_v46  ;;  %v99_v62 = vld [vmem:[#allocation5 + $0x138] sm:$0xff] }
  0x57   :  { %574 = vmatprep.subr.bf16.mxu0 %v573_v55  ;;  %v177_v22 = vld [vmem:[#allocation5 + $0x3a8] sm:$0xff]  ;;  %v521_v26 = vpack.c.bf16 %v181_v21, %v173_v20  ;;  %v587_v37 = vpack.c.bf16 %v184_v31, %v176_v30  ;;  %v52_v48 = vld [vmem:[#allocation2] sm:$0xff]  ;;  %v59_v55 = vld [vmem:[#allocation2 + $0x38] sm:$0xff] }
  0x58   :  { %v185_v23 = vld [vmem:[#allocation5 + $0x3e8] sm:$0xff]  ;;  %v56_v50 = vld [vmem:[#allocation2 + $0x20] sm:$0xff]  ;;  %v107_v63 = vld [vmem:[#allocation5 + $0x178] sm:$0xff] }
  0x59   :  { %v585_v27 = vpack.c.bf16 %v185_v23, %v177_v22  ;;  %v94_v4 = vld [vmem:[#allocation5 + $0x110] sm:$0xff]  ;;  %v111_v8 = vld [vmem:[#allocation5 + $0x198] sm:$0xff] }
  0x5a   :  { %v102_v5 = vld [vmem:[#allocation5 + $0x150] sm:$0xff]  ;;  %v119_v9 = vld [vmem:[#allocation5 + $0x1d8] sm:$0xff] }
  0x5b   :  { %v98_v6 = vld [vmem:[#allocation5 + $0x130] sm:$0xff]  ;;  %v115_v10 = vld [vmem:[#allocation5 + $0x1b8] sm:$0xff] }
  0x5c   :  { %512 = vmatpush1.bf16.xpose.msra.mxu1 %v511_v0  ;;  %v531_v0 = vpack.c.bf16 %v86_v57, %v78_v56  ;;  %v106_v7 = vld [vmem:[#allocation5 + $0x170] sm:$0xff]  ;;  %v123_v11 = vld [vmem:[#allocation5 + $0x1f8] sm:$0xff] }
  0x5d   :  { %514 = vmatprep.subr.bf16.mxu1 %v513_v2  ;;  %v533_v2 = vpack.c.bf16 %v103_v61, %v95_v60  ;;  %v110_v16 = vld [vmem:[#allocation5 + $0x190] sm:$0xff]  ;;  %v127_v20 = vld [vmem:[#allocation5 + $0x218] sm:$0xff] }
  0x5e   :  { %576 = vmatpush1.bf16.xpose.msra.mxu0 %v575_v1  ;;  %v595_v1 = vpack.c.bf16 %v90_v59, %v82_v58  ;;  %v118_v17 = vld [vmem:[#allocation5 + $0x1d0] sm:$0xff]  ;;  %v135_v21 = vld [vmem:[#allocation5 + $0x258] sm:$0xff] }
  0x5f   :  { %578 = vmatprep.subr.bf16.mxu0 %v577_v3  ;;  %v597_v3 = vpack.c.bf16 %v107_v63, %v99_v62  ;;  %v114_v18 = vld [vmem:[#allocation5 + $0x1b0] sm:$0xff]  ;;  %v131_v22 = vld [vmem:[#allocation5 + $0x238] sm:$0xff] }
  0x60   :  { %v122_v19 = vld [vmem:[#allocation5 + $0x1f0] sm:$0xff]  ;;  %v139_v23 = vld [vmem:[#allocation5 + $0x278] sm:$0xff] }
  0x61   :  { %v126_v28 = vld [vmem:[#allocation5 + $0x210] sm:$0xff]  ;;  %v143_v32 = vld [vmem:[#allocation5 + $0x298] sm:$0xff] }
  0x62   :  { %v134_v29 = vld [vmem:[#allocation5 + $0x250] sm:$0xff]  ;;  %v151_v33 = vld [vmem:[#allocation5 + $0x2d8] sm:$0xff] }
  0x63   :  { %v130_v30 = vld [vmem:[#allocation5 + $0x230] sm:$0xff]  ;;  %v147_v34 = vld [vmem:[#allocation5 + $0x2b8] sm:$0xff] }
  0x64   :  { %516 = vmatpush1.bf16.xpose.msra.mxu1 %v515_v12  ;;  %v535_v12 = vpack.c.bf16 %v102_v5, %v94_v4  ;;  %v138_v31 = vld [vmem:[#allocation5 + $0x270] sm:$0xff]  ;;  %v155_v35 = vld [vmem:[#allocation5 + $0x2f8] sm:$0xff] }
  0x65   :  { %518 = vmatprep.subr.bf16.mxu1 %v517_v14  ;;  %v537_v14 = vpack.c.bf16 %v119_v9, %v111_v8  ;;  %v142_v40 = vld [vmem:[#allocation5 + $0x290] sm:$0xff]  ;;  %v159_v44 = vld [vmem:[#allocation5 + $0x318] sm:$0xff]  ;;  %v492_v8 = vld [vmem:[#allocation7] ss:$0 sm:$0xff] }
  0x66   :  { %580 = vmatpush1.bf16.xpose.msra.mxu0 %v579_v13  ;;  %v599_v13 = vpack.c.bf16 %v106_v7, %v98_v6  ;;  %v150_v41 = vld [vmem:[#allocation5 + $0x2d0] sm:$0xff]  ;;  %v167_v45 = vld [vmem:[#allocation5 + $0x358] sm:$0xff] }
  0x67   :  { %582 = vmatprep.subr.bf16.mxu0 %v581_v15  ;;  %v601_v15 = vpack.c.bf16 %v123_v11, %v115_v10  ;;  %v146_v42 = vld [vmem:[#allocation5 + $0x2b0] sm:$0xff]  ;;  %v163_v46 = vld [vmem:[#allocation5 + $0x338] sm:$0xff] }
  0x68   :  { %v154_v43 = vld [vmem:[#allocation5 + $0x2f0] sm:$0xff]  ;;  %v171_v47 = vld [vmem:[#allocation5 + $0x378] sm:$0xff] }
  0x69   :  { %v175_v56 = vld [vmem:[#allocation5 + $0x398] sm:$0xff]  ;;  %v54_v6 = vld [vmem:[#allocation2 + $0x10] sm:$0xff] }
  0x6a   :  { %v183_v57 = vld [vmem:[#allocation5 + $0x3d8] sm:$0xff]  ;;  %v58_v7 = vld [vmem:[#allocation2 + $0x30] sm:$0xff] }
  0x6b   :  { %v179_v58 = vld [vmem:[#allocation5 + $0x3b8] sm:$0xff]  ;;  %v553_v62 = vpack.c.bf16 %v183_v57, %v175_v56 }
  0x6c   :  { %520 = vmatpush1.bf16.xpose.msra.mxu1 %v519_v24  ;;  %v539_v24 = vpack.c.bf16 %v118_v17, %v110_v16  ;;  %v187_v59 = vld [vmem:[#allocation5 + $0x3f8] sm:$0xff] }
  0x6d   :  { %522 = vmatprep.subr.bf16.mxu1 %v521_v26  ;;  %v541_v26 = vpack.c.bf16 %v135_v21, %v127_v20  ;;  %v617_v63 = vpack.c.bf16 %v187_v59, %v179_v58 }
  0x6e   :  { %584 = vmatpush1.bf16.xpose.msra.mxu0 %v583_v25  ;;  %v603_v25 = vpack.c.bf16 %v122_v19, %v114_v18 }
  0x6f   :  { %586 = vmatprep.subr.bf16.mxu0 %v585_v27  ;;  %v605_v27 = vpack.c.bf16 %v139_v23, %v131_v22 }
  0x74   :  { %524 = vmatpush1.bf16.xpose.msra.mxu1 %v523_v36  ;;  %v543_v36 = vpack.c.bf16 %v134_v29, %v126_v28 }
  0x75   :  { %526 = vmatprep.subr.bf16.mxu1 %v525_v38  ;;  %v545_v38 = vpack.c.bf16 %v151_v33, %v143_v32 }
  0x76   :  { %588 = vmatpush1.bf16.xpose.msra.mxu0 %v587_v37  ;;  %v607_v37 = vpack.c.bf16 %v138_v31, %v130_v30 }
  0x77   :  { %590 = vmatprep.subr.bf16.mxu0 %v589_v39  ;;  %v609_v39 = vpack.c.bf16 %v155_v35, %v147_v34 }
  0x7b   :  { %260 = vmatmul.mubr.f32.vlgmr.msra.gmra.mrb[0].mxu1 %v52_v48  ;;  %v547_v48 = vpack.c.bf16 %v150_v41, %v142_v40 }
  0x7c   :  { %528 = vmatpush1.bf16.xpose.msra.mxu1 %v527_v49  ;;  %329 = vmatprep.mubr.f32.mxu1 %v55_v54  ;;  %v611_v49 = vpack.c.bf16 %v154_v43, %v146_v42  ;;  %v162_v54 = vld [vmem:[#allocation5 + $0x330] sm:$0xff] }
  0x7d   :  { %400 = vmatmul.mubr.f32.vlgmr.msra.gmra.mrb[0].mxu0 %v56_v50  ;;  %530 = vmatprep.subr.bf16.mxu1 %v529_v52  ;;  %v549_v50 = vpack.c.bf16 %v167_v45, %v159_v44  ;;  %v158_v52 = vld [vmem:[#allocation5 + $0x310] sm:$0xff] }
  0x7e   :  { %592 = vmatpush1.bf16.xpose.msra.mxu0 %v591_v51  ;;  %469 = vmatprep.mubr.f32.mxu0 %v59_v55  ;;  %v613_v51 = vpack.c.bf16 %v171_v47, %v163_v46  ;;  %v170_v55 = vld [vmem:[#allocation5 + $0x370] sm:$0xff] }
  0x7f   :  { %594 = vmatprep.subr.bf16.mxu0 %v593_v53  ;;  %v166_v53 = vld [vmem:[#allocation5 + $0x350] sm:$0xff]  ;;  %v615_v61 = vpack.c.bf16 %v170_v55, %v162_v54 }
  0x80   :  { %v551_v60 = vpack.c.bf16 %v166_v53, %v158_v52 }
  0x84   :  { %532 = vmatpush1.bf16.xpose.msra.mxu1 %v531_v0  ;;  %v174_v0 = vld [vmem:[#allocation5 + $0x390] sm:$0xff] }
  0x85   :  { %534 = vmatprep.subr.bf16.mxu1 %v533_v2  ;;  %v178_v2 = vld [vmem:[#allocation5 + $0x3b0] sm:$0xff] }
  0x86   :  { %596 = vmatpush1.bf16.xpose.msra.mxu0 %v595_v1  ;;  %v182_v1 = vld [vmem:[#allocation5 + $0x3d0] sm:$0xff] }
  0x87   :  { %598 = vmatprep.subr.bf16.mxu0 %v597_v3  ;;  %v186_v3 = vld [vmem:[#allocation5 + $0x3f0] sm:$0xff]  ;;  %v555_v4 = vpack.c.bf16 %v182_v1, %v174_v0 }
  0x88   :  { %v619_v5 = vpack.c.bf16 %v186_v3, %v178_v2 }
  0x8c   :  { %536 = vmatpush1.bf16.xpose.msra.mxu1 %v535_v12 }
  0x8d   :  { %538 = vmatprep.subr.bf16.mxu1 %v537_v14 }
  0x8e   :  { %600 = vmatpush1.bf16.xpose.msra.mxu0 %v599_v13 }
  0x8f   :  { %602 = vmatprep.subr.bf16.mxu0 %v601_v15 }
  0x94   :  { %540 = vmatpush1.bf16.xpose.msra.mxu1 %v539_v24 }
  0x95   :  { %542 = vmatprep.subr.bf16.mxu1 %v541_v26 }
  0x96   :  { %604 = vmatpush1.bf16.xpose.msra.mxu0 %v603_v25 }
  0x97   :  { %606 = vmatprep.subr.bf16.mxu0 %v605_v27 }
  0x9c   :  { %544 = vmatpush1.bf16.xpose.msra.mxu1 %v543_v36 }
  0x9d   :  { %546 = vmatprep.subr.bf16.mxu1 %v545_v38 }
  0x9e   :  { %608 = vmatpush1.bf16.xpose.msra.mxu0 %v607_v37 }
  0x9f   :  { %610 = vmatprep.subr.bf16.mxu0 %v609_v39 }
  0xa4   :  { %548 = vmatpush1.bf16.xpose.msra.mxu1 %v547_v48 }
  0xa5   :  { %550 = vmatprep.subr.bf16.mxu1 %v549_v50 }
  0xa6   :  { %612 = vmatpush1.bf16.xpose.msra.mxu0 %v611_v49 }
  0xa7   :  { %614 = vmatprep.subr.bf16.mxu0 %v613_v51 }
  0xac   :  { %552 = vmatpush1.bf16.xpose.msra.mxu1 %v551_v60 }
  0xad   :  { %554 = vmatprep.subr.bf16.mxu1 %v553_v62 }
  0xae   :  { %616 = vmatpush1.bf16.xpose.msra.mxu0 %v615_v61 }
  0xaf   :  { %618 = vmatprep.subr.bf16.mxu0 %v617_v63 }
  0xb4   :  { %556 = vmatpush1.bf16.xpose.msra.mxu1 %v555_v4 }
  0xb6   :  { %620 = vmatpush1.bf16.xpose.msra.mxu0 %v619_v5 }
  0xbb   :  { %330 = vmatmul.mubr.f32.vlgmr.msra.gmra.mrb[0].mxu1 %v54_v6 }
  0xbd   :  { %470 = vmatmul.mubr.f32.vlgmr.msra.gmra.mrb[0].mxu0 %v58_v7 }
 0x18e   :  { %v331_v9 = vpop.f32.mrb[0].mxu1 }
 0x18f   :  { %v621_v10 = vadd.f32 %v492_v8, %v331_v9  ;;  %v333_v12 = vpop.f32.mrb[1].mxu1 }
 0x190   :  { %v471_v11 = vpop.f32.mrb[0].mxu0 }
 0x191   :  { %v473_v13 = vpop.f32.mrb[1].mxu0  ;;  %v622_v14 = vadd.f32 %v621_v10, %v471_v11 }
 0x193   :  { %475 = vst [vmem:[#allocation8] sm:$0xff] %v622_v14 }
 0x194   :  { %710 = shalt.err (!%p707_p0)
}
 0x195   :  { %s711_s26 = scalar_lea.hbm %s804_s3, 128 }
 0x196   :  { %p712_p1 = scmp.ne.s32.totalorder %s804_s3, %s711_s26  ;;  %p715_p2 = scmp.lt.u32.totalorder %s711_s26, %s804_s3 }
 0x198   :  { %p717_p3 = pnand %p715_p2, %p712_p1 }
 0x19a   :  { %720 = shalt.err (!%p717_p3)
}
 0x19b   :  { %485 = dma.vmem_to_hbm [thread:$0]  %s483_s22, 128, %s804_s3, [#allocation4]  }
 0x19c   :  { %725 = dma.done.wait [#allocation4], 128  }
 0x19d   :  { %726 = vsyncadd [#allocation4], 4294967168 }
 0x19e   :  { %489 = vsyncpa [#allocation3], 1 }
 0x19f   :  { %490 = vsyncpa [#allocation6], 1 }
 0x1a0   :  { %491 = vsyncpa [#allocation4], 1 }

</bundles_post_ra>
